<compile_context>
chip_gen: v6e
topology: v6e:2x2x1
jax: 0.10.0
libtpu: 0.0.40
codegen_flags: <defaults>
</compile_context>

<pallas_src>
import functools

import jax
import jax.numpy as jnp
from jax.experimental import pallas as pl
from jax.experimental.pallas import tpu as pltpu


def _round_up(x, m):
    return (x + m - 1) // m * m


def _choose_batch_tile(B, max_tile=1024):
    """~Half the (8-aligned) batch per tile, capped at max_tile.

    >=2 grid steps lets the "parallel" batch axis shard across both
    TensorCores on v7x; the cap keeps per-step MXU work large enough to
    amortize per-grid-step overhead while staying tiny in VMEM.
    """
    b8 = _round_up(max(B, 1), 8)
    half = _round_up((b8 + 1) // 2, 8)
    return max(8, min(max_tile, half))


@functools.lru_cache(maxsize=None)
def _bf16_activations_default():
    # v5e's VPU has no native bf16: keep inter-layer activations in f32 there
    # (the compiler would otherwise insert extra converts).  v6e/v7x benefit
    # from bf16 activations (half the cast/spill bytes).
    try:
        kind = jax.devices()[0].device_kind.lower()
    except Exception:
        return True
    return not ("v5 lite" in kind or "v5e" in kind or "v5lite" in kind)


# -----------------------------------------------------------------------------
# Kernel: entire MLP (src/dst layer + h1..h4 + head) for one batch tile.
# -----------------------------------------------------------------------------
def _mlp_kernel(
    src_ref, dst_ref,                 # (bt, feat) bf16 each
    w_sh_ref, w_dh_ref,               # (feat, hid) bf16 each
    w_h1_ref,                         # (2*hid, hid) bf16
    w_h2_ref, w_h3_ref, w_h4_ref,     # (hid, hid) bf16 each
    b_ref,                            # (1, 6*hid) f32: [b_sh|b_dh|b_h1..b_h4]
    w_ca_ref,                         # (1, hid) f32 head row
    b_ca_ref,                         # (1, 1) f32 in SMEM
    out_ref,                          # (1, 1, bt) f32 lane-dense sigmoid outputs
    *, hidden, act_dtype,
):
    H = hidden
    f32 = jnp.float32

    # Layer 0: two bf16 MXU dots (src & dst branches), f32 bias + ReLU,
    # then the (bt, 2H) concat happens directly in VMEM (essentially free).
    s = jnp.dot(src_ref[...], w_sh_ref[...], preferred_element_type=f32)
    s = jnp.maximum(s + b_ref[:, 0:H], 0.0)
    d = jnp.dot(dst_ref[...], w_dh_ref[...], preferred_element_type=f32)
    d = jnp.maximum(d + b_ref[:, H:2 * H], 0.0)
    h = jnp.concatenate([s, d], axis=1).astype(act_dtype)        # (bt, 2H)

    def layer(h, w_ref, b_off, out_dtype):
        acc = jnp.dot(h.astype(jnp.bfloat16), w_ref[...],
                      preferred_element_type=f32)
        return jnp.maximum(acc + b_ref[:, b_off:b_off + H], 0.0).astype(out_dtype)

    h = layer(h, w_h1_ref, 2 * H, act_dtype)     # (bt, 2H) @ (2H, H)
    h = layer(h, w_h2_ref, 3 * H, act_dtype)
    h = layer(h, w_h3_ref, 4 * H, act_dtype)
    h = layer(h, w_h4_ref, 5 * H, f32)           # keep f32 for the f32 head

    # Head, computed transposed so the logits row (1, bt) is lane-dense:
    #   logits_T[1, bt] = w_ca[1, H] . h[bt, H]^T   (contract the H dims)
    logits = jax.lax.dot_general(
        w_ca_ref[...], h,
        dimension_numbers=(((1,), (1,)), ((), ())),
        preferred_element_type=f32,
    ) + b_ca_ref[0, 0]                            # (1, bt)
    out_ref[0] = jax.nn.sigmoid(logits)


# -----------------------------------------------------------------------------
# One-time parameter packing (hoisted out of the per-call path).
# -----------------------------------------------------------------------------
def pack_params(params):
    f32, bf16 = jnp.float32, jnp.bfloat16
    hidden = params["w_sh"].shape[1]
    b_pack = jnp.concatenate(
        [params["b_sh"], params["b_dh"], params["b_h1"],
         params["b_h2"], params["b_h3"], params["b_h4"]], axis=1).astype(f32)
    return {
        "hidden": hidden,
        "w_sh": params["w_sh"].astype(bf16),
        "w_dh": params["w_dh"].astype(bf16),
        "w_h1": params["w_h1"].astype(bf16),
        "w_h2": params["w_h2"].astype(bf16),
        "w_h3": params["w_h3"].astype(bf16),
        "w_h4": params["w_h4"].astype(bf16),
        "b_pack": b_pack,                                   # (1, 6*hidden)
        "w_ca": params["w_ca"].reshape(1, hidden).astype(f32),
        "b_ca": params["b_ca"].reshape(1, 1).astype(f32),
    }


# -----------------------------------------------------------------------------
# Forward wrapper
# -----------------------------------------------------------------------------
def binary_classifier_forward(src, dst, packed, *, batch_tile=None,
                              max_batch_tile=1024, bf16_activations=None):
    B, feat = src.shape
    hidden = packed["hidden"]
    if bf16_activations is None:
        bf16_activations = _bf16_activations_default()

    if batch_tile is None:
        batch_tile = _choose_batch_tile(B, max_batch_tile)
    B_pad = _round_up(B, batch_tile)
    num_tiles = B_pad // batch_tile

    # bf16 input DMA (the MXU consumes bf16 anyway); explicit zero padding for
    # ragged batches (padded rows are sliced off below).
    src_b = src.astype(jnp.bfloat16)
    dst_b = dst.astype(jnp.bfloat16)
    if B_pad != B:
        pad = ((0, B_pad - B), (0, 0))
        src_b = jnp.pad(src_b, pad)
        dst_b = jnp.pad(dst_b, pad)

    weight_args = (packed["w_sh"], packed["w_dh"], packed["w_h1"],
                   packed["w_h2"], packed["w_h3"], packed["w_h4"],
                   packed["b_pack"], packed["w_ca"])

    # Constant block index -> weights are DMA'd once, not per grid step.
    def const_spec(a):
        return pl.BlockSpec(a.shape, lambda i: (0, 0))

    in_specs = [pl.BlockSpec((batch_tile, feat), lambda i: (i, 0)),
                pl.BlockSpec((batch_tile, feat), lambda i: (i, 0))]
    in_specs += [const_spec(a) for a in weight_args]
    in_specs += [pl.BlockSpec(memory_space=pltpu.MemorySpace.SMEM)]   # b_ca

    # Lane-dense output: one (1, 1, batch_tile) slab per grid step.
    out_spec = pl.BlockSpec((1, 1, batch_tile), lambda i: (i, 0, 0))

    kernel = functools.partial(
        _mlp_kernel, hidden=hidden,
        act_dtype=(jnp.bfloat16 if bf16_activations else jnp.float32),
    )

    out = pl.pallas_call(
        kernel,
        out_shape=jax.ShapeDtypeStruct((num_tiles, 1, batch_tile), jnp.float32),
        grid_spec=pltpu.PrefetchScalarGridSpec(
            num_scalar_prefetch=0,
            grid=(num_tiles,),
            in_specs=in_specs,
            out_specs=out_spec,
        ),
        compiler_params=pltpu.CompilerParams(
            dimension_semantics=("parallel",),
            vmem_limit_bytes=(48 << 20) if batch_tile >= 1024 else None,
        ),
    )(src_b, dst_b, *weight_args, packed["b_ca"])

    return out.reshape(B_pad, 1)[:B]


# -----------------------------------------------------------------------------
# Deterministic parameter init (synthetic; shapes from the module __init__).
# -----------------------------------------------------------------------------
def init_params(key, feat_dim, hidden_dim):
    def linear(key, fan_in, fan_out, xavier=False):
        kw, kb = jax.random.split(key)
        if xavier:
            std = (2.0 / (fan_in + fan_out)) ** 0.5
            w = std * jax.random.normal(kw, (fan_in, fan_out), jnp.float32)
        else:
            bound = 1.0 / (fan_in ** 0.5)
            w = jax.random.uniform(kw, (fan_in, fan_out), jnp.float32,
                                   -bound, bound)
        bound = 1.0 / (fan_in ** 0.5)
        b = jax.random.uniform(kb, (1, fan_out), jnp.float32, -bound, bound)
        return w, b

    keys = jax.random.split(key, 7)
    p = {}
    p["w_sh"], p["b_sh"] = linear(keys[0], feat_dim, hidden_dim)
    p["w_dh"], p["b_dh"] = linear(keys[1], feat_dim, hidden_dim)
    p["w_h1"], p["b_h1"] = linear(keys[2], 2 * hidden_dim, hidden_dim)
    p["w_h2"], p["b_h2"] = linear(keys[3], hidden_dim, hidden_dim)
    p["w_h3"], p["b_h3"] = linear(keys[4], hidden_dim, hidden_dim)
    p["w_h4"], p["b_h4"] = linear(keys[5], hidden_dim, hidden_dim)
    # linear_ca: layers_num=5 (>2) -> in = hidden_dim, out = 1, xavier-normal W
    p["w_ca"], p["b_ca"] = linear(keys[6], hidden_dim, 1, xavier=True)
    return p


# Pure-JAX reference (original module structure). dot_dtype=bf16 mirrors the
# kernel's mixed-precision MXU path; dot_dtype=f32 is the exact module math.
def reference_forward(src, dst, p, dot_dtype=jnp.float32):
    cast = lambda a: a.astype(dot_dtype)
    dot = lambda a, w: jnp.dot(cast(a), cast(w),
                               preferred_element_type=jnp.float32)
    relu = lambda x: jnp.maximum(x, 0.0)
    s = relu(dot(src, p["w_sh"]) + p["b_sh"])
    d = relu(dot(dst, p["w_dh"]) + p["b_dh"])
    h = jnp.concatenate([s, d], axis=1)
    h = relu(dot(h, p["w_h1"]) + p["b_h1"])
    h = relu(dot(h, p["w_h2"]) + p["b_h2"])
    h = relu(dot(h, p["w_h3"]) + p["b_h3"])
    h = relu(dot(h, p["w_h4"]) + p["b_h4"])
    return jax.nn.sigmoid(h @ p["w_ca"] + p["b_ca"])   # head kept in f32


if __name__ == "__main__":
    B, FEAT, HIDDEN = 16, 32, 128   # layers_num=5 path

    key = jax.random.PRNGKey(0)
    k_src, k_dst, k_par = jax.random.split(key, 3)
    src = jax.random.normal(k_src, (B, FEAT), jnp.float32)
    dst = jax.random.normal(k_dst, (B, FEAT), jnp.float32)
    params = init_params(k_par, FEAT, HIDDEN)
    packed = pack_params(params)   # one-time weight packing

    out = jax.block_until_ready(binary_classifier_forward(src, dst, packed))
    assert out.shape == (B, 1)

    ref_bf16 = reference_forward(src, dst, params, dot_dtype=jnp.bfloat16)
    ref_f32 = reference_forward(src, dst, params, dot_dtype=jnp.float32)
    assert jnp.allclose(out, ref_bf16, atol=1e-4, rtol=1e-4), \
        "mismatch vs bf16 reference"
    assert jnp.allclose(out, ref_f32, atol=5e-2, rtol=5e-2), \
        "mismatch vs f32 reference"

    # Ragged batch: two 152-row tiles, zero padding sliced off.
    B2 = 300
    src2 = jax.random.normal(jax.random.PRNGKey(1), (B2, FEAT), jnp.float32)
    dst2 = jax.random.normal(jax.random.PRNGKey(2), (B2, FEAT), jnp.float32)
    out2 = jax.block_until_ready(binary_classifier_forward(src2, dst2, packed))
    ref2 = reference_forward(src2, dst2, params, dot_dtype=jnp.bfloat16)
    assert out2.shape == (B2, 1)
    assert jnp.allclose(out2, ref2, atol=1e-4, rtol=1e-4), \
        "mismatch on tiled batch"

    # Large batch: exercises 1024-row tiles, multi-tile grid and the explicit
    # vmem_limit_bytes path.
    B3 = 2176
    src3 = jax.random.normal(jax.random.PRNGKey(3), (B3, FEAT), jnp.float32)
    dst3 = jax.random.normal(jax.random.PRNGKey(4), (B3, FEAT), jnp.float32)
    out3 = jax.block_until_ready(binary_classifier_forward(src3, dst3, packed))
    ref3 = reference_forward(src3, dst3, params, dot_dtype=jnp.bfloat16)
    assert out3.shape == (B3, 1)
    assert jnp.allclose(out3, ref3, atol=1e-4, rtol=1e-4), \
        "mismatch on large batch"

    print("KERNEL_OK")
</pallas_src>

<mosaic_0001>
module attributes {stable_mosaic.version = 11 : i64} {
  func.func @_mlp_kernel(%arg0: i32, %arg1: memref<8x32xbf16, #tpu.memory_space<vmem>>, %arg2: memref<8x32xbf16, #tpu.memory_space<vmem>>, %arg3: memref<32x128xbf16, #tpu.memory_space<vmem>>, %arg4: memref<32x128xbf16, #tpu.memory_space<vmem>>, %arg5: memref<256x128xbf16, #tpu.memory_space<vmem>>, %arg6: memref<128x128xbf16, #tpu.memory_space<vmem>>, %arg7: memref<128x128xbf16, #tpu.memory_space<vmem>>, %arg8: memref<128x128xbf16, #tpu.memory_space<vmem>>, %arg9: memref<1x768xf32, #tpu.memory_space<vmem>>, %arg10: memref<1x128xf32, #tpu.memory_space<vmem>>, %arg11: memref<1x1xf32, #tpu.memory_space<smem>>, %arg12: memref<1x1x8xf32, #tpu.memory_space<vmem>>) attributes {dimension_semantics = [#tpu.dimension_semantics<parallel>], iteration_bounds = array<i64: 2>, scalar_prefetch = 0 : i64, scratch_operands = 0 : i64, tpu.core_type = #tpu.core_type<tc>, window_params = [{transform_indices = @transform_0, window_bounds = array<i64: 8, 32>}, {transform_indices = @transform_1, window_bounds = array<i64: 8, 32>}, {pipeline_mode = #tpu.pipeline_mode<synchronous>, transform_indices = @transform_2, window_bounds = array<i64: 32, 128>}, {pipeline_mode = #tpu.pipeline_mode<synchronous>, transform_indices = @transform_3, window_bounds = array<i64: 32, 128>}, {pipeline_mode = #tpu.pipeline_mode<synchronous>, transform_indices = @transform_4, window_bounds = array<i64: 256, 128>}, {pipeline_mode = #tpu.pipeline_mode<synchronous>, transform_indices = @transform_5, window_bounds = array<i64: 128, 128>}, {pipeline_mode = #tpu.pipeline_mode<synchronous>, transform_indices = @transform_6, window_bounds = array<i64: 128, 128>}, {pipeline_mode = #tpu.pipeline_mode<synchronous>, transform_indices = @transform_7, window_bounds = array<i64: 128, 128>}, {pipeline_mode = #tpu.pipeline_mode<synchronous>, transform_indices = @transform_8, window_bounds = array<i64: 1, 768>}, {pipeline_mode = #tpu.pipeline_mode<synchronous>, transform_indices = @transform_9, window_bounds = array<i64: 1, 128>}, {transform_indices = @transform_10, window_bounds = array<i64: 1, 1>}, {transform_indices = @transform_11, window_bounds = array<i64: 1, 1, 8>}]} {
    %c0 = arith.constant 0 : index
    %c0_0 = arith.constant 0 : index
    %0 = vector.load %arg1[%c0, %c0_0] : memref<8x32xbf16, #tpu.memory_space<vmem>>, vector<8x32xbf16>
    %c0_1 = arith.constant 0 : index
    %c0_2 = arith.constant 0 : index
    %1 = vector.load %arg3[%c0_1, %c0_2] : memref<32x128xbf16, #tpu.memory_space<vmem>>, vector<32x128xbf16>
    %cst = arith.constant dense<0.000000e+00> : vector<8x128xf32>
    %2 = tpu.matmul %0, %1, %cst {dimension_numbers = #tpu.dot_dimension_numbers<[1], [0], [0], [1], [0, 0, 1, 1], [], []>} : vector<8x32xbf16>, vector<32x128xbf16>, vector<8x128xf32> -> vector<8x128xf32>
    %c0_3 = arith.constant 0 : index
    %c0_4 = arith.constant 0 : index
    %3 = vector.load %arg9[%c0_3, %c0_4] : memref<1x768xf32, #tpu.memory_space<vmem>>, vector<1x128xf32>
    %4 = vector.broadcast %3 : vector<1x128xf32> to vector<8x128xf32>
    %5 = arith.addf %2, %4 : vector<8x128xf32>
    %cst_5 = arith.constant 0.000000e+00 : f32
    %6 = vector.broadcast %cst_5 : f32 to vector<8x128xf32>
    %7 = arith.maximumf %5, %6 : vector<8x128xf32>
    %c0_6 = arith.constant 0 : index
    %c0_7 = arith.constant 0 : index
    %8 = vector.load %arg2[%c0_6, %c0_7] : memref<8x32xbf16, #tpu.memory_space<vmem>>, vector<8x32xbf16>
    %c0_8 = arith.constant 0 : index
    %c0_9 = arith.constant 0 : index
    %9 = vector.load %arg4[%c0_8, %c0_9] : memref<32x128xbf16, #tpu.memory_space<vmem>>, vector<32x128xbf16>
    %cst_10 = arith.constant dense<0.000000e+00> : vector<8x128xf32>
    %10 = tpu.matmul %8, %9, %cst_10 {dimension_numbers = #tpu.dot_dimension_numbers<[1], [0], [0], [1], [0, 0, 1, 1], [], []>} : vector<8x32xbf16>, vector<32x128xbf16>, vector<8x128xf32> -> vector<8x128xf32>
    %c0_11 = arith.constant 0 : index
    %c128 = arith.constant 128 : index
    %11 = vector.load %arg9[%c0_11, %c128] : memref<1x768xf32, #tpu.memory_space<vmem>>, vector<1x128xf32>
    %12 = vector.broadcast %11 : vector<1x128xf32> to vector<8x128xf32>
    %13 = arith.addf %10, %12 : vector<8x128xf32>
    %cst_12 = arith.constant 0.000000e+00 : f32
    %14 = vector.broadcast %cst_12 : f32 to vector<8x128xf32>
    %15 = arith.maximumf %13, %14 : vector<8x128xf32>
    %16 = tpu.concatenate %7, %15 in 1 : vector<8x128xf32>, vector<8x128xf32> -> vector<8x256xf32>
    %17 = arith.truncf %16 : vector<8x256xf32> to vector<8x256xbf16>
    %c0_13 = arith.constant 0 : index
    %c0_14 = arith.constant 0 : index
    %18 = vector.load %arg5[%c0_13, %c0_14] : memref<256x128xbf16, #tpu.memory_space<vmem>>, vector<256x128xbf16>
    %cst_15 = arith.constant dense<0.000000e+00> : vector<8x128xf32>
    %19 = tpu.matmul %17, %18, %cst_15 {dimension_numbers = #tpu.dot_dimension_numbers<[1], [0], [0], [1], [0, 0, 1, 1], [], []>} : vector<8x256xbf16>, vector<256x128xbf16>, vector<8x128xf32> -> vector<8x128xf32>
    %c0_16 = arith.constant 0 : index
    %c256 = arith.constant 256 : index
    %20 = vector.load %arg9[%c0_16, %c256] : memref<1x768xf32, #tpu.memory_space<vmem>>, vector<1x128xf32>
    %21 = vector.broadcast %20 : vector<1x128xf32> to vector<8x128xf32>
    %22 = arith.addf %19, %21 : vector<8x128xf32>
    %cst_17 = arith.constant 0.000000e+00 : f32
    %23 = vector.broadcast %cst_17 : f32 to vector<8x128xf32>
    %24 = arith.maximumf %22, %23 : vector<8x128xf32>
    %25 = arith.truncf %24 : vector<8x128xf32> to vector<8x128xbf16>
    %c0_18 = arith.constant 0 : index
    %c0_19 = arith.constant 0 : index
    %26 = vector.load %arg6[%c0_18, %c0_19] : memref<128x128xbf16, #tpu.memory_space<vmem>>, vector<128x128xbf16>
    %cst_20 = arith.constant dense<0.000000e+00> : vector<8x128xf32>
    %27 = tpu.matmul %25, %26, %cst_20 {dimension_numbers = #tpu.dot_dimension_numbers<[1], [0], [0], [1], [0, 0, 1, 1], [], []>} : vector<8x128xbf16>, vector<128x128xbf16>, vector<8x128xf32> -> vector<8x128xf32>
    %c0_21 = arith.constant 0 : index
    %c384 = arith.constant 384 : index
    %28 = vector.load %arg9[%c0_21, %c384] : memref<1x768xf32, #tpu.memory_space<vmem>>, vector<1x128xf32>
    %29 = vector.broadcast %28 : vector<1x128xf32> to vector<8x128xf32>
    %30 = arith.addf %27, %29 : vector<8x128xf32>
    %cst_22 = arith.constant 0.000000e+00 : f32
    %31 = vector.broadcast %cst_22 : f32 to vector<8x128xf32>
    %32 = arith.maximumf %30, %31 : vector<8x128xf32>
    %33 = arith.truncf %32 : vector<8x128xf32> to vector<8x128xbf16>
    %c0_23 = arith.constant 0 : index
    %c0_24 = arith.constant 0 : index
    %34 = vector.load %arg7[%c0_23, %c0_24] : memref<128x128xbf16, #tpu.memory_space<vmem>>, vector<128x128xbf16>
    %cst_25 = arith.constant dense<0.000000e+00> : vector<8x128xf32>
    %35 = tpu.matmul %33, %34, %cst_25 {dimension_numbers = #tpu.dot_dimension_numbers<[1], [0], [0], [1], [0, 0, 1, 1], [], []>} : vector<8x128xbf16>, vector<128x128xbf16>, vector<8x128xf32> -> vector<8x128xf32>
    %c0_26 = arith.constant 0 : index
    %c512 = arith.constant 512 : index
    %36 = vector.load %arg9[%c0_26, %c512] : memref<1x768xf32, #tpu.memory_space<vmem>>, vector<1x128xf32>
    %37 = vector.broadcast %36 : vector<1x128xf32> to vector<8x128xf32>
    %38 = arith.addf %35, %37 : vector<8x128xf32>
    %cst_27 = arith.constant 0.000000e+00 : f32
    %39 = vector.broadcast %cst_27 : f32 to vector<8x128xf32>
    %40 = arith.maximumf %38, %39 : vector<8x128xf32>
    %41 = arith.truncf %40 : vector<8x128xf32> to vector<8x128xbf16>
    %c0_28 = arith.constant 0 : index
    %c0_29 = arith.constant 0 : index
    %42 = vector.load %arg8[%c0_28, %c0_29] : memref<128x128xbf16, #tpu.memory_space<vmem>>, vector<128x128xbf16>
    %cst_30 = arith.constant dense<0.000000e+00> : vector<8x128xf32>
    %43 = tpu.matmul %41, %42, %cst_30 {dimension_numbers = #tpu.dot_dimension_numbers<[1], [0], [0], [1], [0, 0, 1, 1], [], []>} : vector<8x128xbf16>, vector<128x128xbf16>, vector<8x128xf32> -> vector<8x128xf32>
    %c0_31 = arith.constant 0 : index
    %c640 = arith.constant 640 : index
    %44 = vector.load %arg9[%c0_31, %c640] : memref<1x768xf32, #tpu.memory_space<vmem>>, vector<1x128xf32>
    %45 = vector.broadcast %44 : vector<1x128xf32> to vector<8x128xf32>
    %46 = arith.addf %43, %45 : vector<8x128xf32>
    %cst_32 = arith.constant 0.000000e+00 : f32
    %47 = vector.broadcast %cst_32 : f32 to vector<8x128xf32>
    %48 = arith.maximumf %46, %47 : vector<8x128xf32>
    %c0_33 = arith.constant 0 : index
    %c0_34 = arith.constant 0 : index
    %49 = vector.load %arg10[%c0_33, %c0_34] : memref<1x128xf32, #tpu.memory_space<vmem>>, vector<1x128xf32>
    %cst_35 = arith.constant dense<0.000000e+00> : vector<1x8xf32>
    %50 = tpu.matmul %49, %48, %cst_35 {dimension_numbers = #tpu.dot_dimension_numbers<[1], [1], [0], [0], [0, 0, 1, 0], [], []>} : vector<1x128xf32>, vector<8x128xf32>, vector<1x8xf32> -> vector<1x8xf32>
    %c0_36 = arith.constant 0 : index
    %c0_37 = arith.constant 0 : index
    %51 = memref.load %arg11[%c0_36, %c0_37] : memref<1x1xf32, #tpu.memory_space<smem>>
    %52 = vector.broadcast %51 : f32 to vector<1x8xf32>
    %53 = arith.addf %50, %52 : vector<1x8xf32>
    %54 = arith.negf %53 : vector<1x8xf32>
    %55 = math.exp %54 : vector<1x8xf32>
    %cst_38 = arith.constant 1.000000e+00 : f32
    %56 = vector.broadcast %cst_38 : f32 to vector<1x8xf32>
    %57 = arith.addf %56, %55 : vector<1x8xf32>
    %58 = arith.divf %56, %57 : vector<1x8xf32>
    %c0_39 = arith.constant 0 : index
    %c0_40 = arith.constant 0 : index
    %c0_41 = arith.constant 0 : index
    %59 = vector.load %arg12[%c0_39, %c0_40, %c0_41] : memref<1x1x8xf32, #tpu.memory_space<vmem>>, vector<1x1x8xf32>
    %60 = vector.shape_cast %59 : vector<1x1x8xf32> to vector<1x8xf32>
    %61 = vector.shape_cast %58 : vector<1x8xf32> to vector<1x1x8xf32>
    tpu.vector_store %arg12[%c0_39, %c0_40, %c0_41], %61 {strides = array<i32>} : memref<1x1x8xf32, #tpu.memory_space<vmem>>, vector<1x1x8xf32>,
    return
  }
  func.func @transform_0(%arg0: i32) -> (i32, i32) {
    %c0_i32 = arith.constant 0 : i32
    %c0_i32_0 = arith.constant 0 : i32
    return %arg0, %c0_i32 : i32, i32
  }
  func.func @transform_1(%arg0: i32) -> (i32, i32) {
    %c0_i32 = arith.constant 0 : i32
    %c0_i32_0 = arith.constant 0 : i32
    return %arg0, %c0_i32 : i32, i32
  }
  func.func @transform_2(%arg0: i32) -> (i32, i32) {
    %c0_i32 = arith.constant 0 : i32
    %c0_i32_0 = arith.constant 0 : i32
    %c0_i32_1 = arith.constant 0 : i32
    return %c0_i32, %c0_i32_0 : i32, i32
  }
  func.func @transform_3(%arg0: i32) -> (i32, i32) {
    %c0_i32 = arith.constant 0 : i32
    %c0_i32_0 = arith.constant 0 : i32
    %c0_i32_1 = arith.constant 0 : i32
    return %c0_i32, %c0_i32_0 : i32, i32
  }
  func.func @transform_4(%arg0: i32) -> (i32, i32) {
    %c0_i32 = arith.constant 0 : i32
    %c0_i32_0 = arith.constant 0 : i32
    %c0_i32_1 = arith.constant 0 : i32
    return %c0_i32, %c0_i32_0 : i32, i32
  }
  func.func @transform_5(%arg0: i32) -> (i32, i32) {
    %c0_i32 = arith.constant 0 : i32
    %c0_i32_0 = arith.constant 0 : i32
    %c0_i32_1 = arith.constant 0 : i32
    return %c0_i32, %c0_i32_0 : i32, i32
  }
  func.func @transform_6(%arg0: i32) -> (i32, i32) {
    %c0_i32 = arith.constant 0 : i32
    %c0_i32_0 = arith.constant 0 : i32
    %c0_i32_1 = arith.constant 0 : i32
    return %c0_i32, %c0_i32_0 : i32, i32
  }
  func.func @transform_7(%arg0: i32) -> (i32, i32) {
    %c0_i32 = arith.constant 0 : i32
    %c0_i32_0 = arith.constant 0 : i32
    %c0_i32_1 = arith.constant 0 : i32
    return %c0_i32, %c0_i32_0 : i32, i32
  }
  func.func @transform_8(%arg0: i32) -> (i32, i32) {
    %c0_i32 = arith.constant 0 : i32
    %c0_i32_0 = arith.constant 0 : i32
    %c0_i32_1 = arith.constant 0 : i32
    return %c0_i32, %c0_i32_0 : i32, i32
  }
  func.func @transform_9(%arg0: i32) -> (i32, i32) {
    %c0_i32 = arith.constant 0 : i32
    %c0_i32_0 = arith.constant 0 : i32
    %c0_i32_1 = arith.constant 0 : i32
    return %c0_i32, %c0_i32_0 : i32, i32
  }
  func.func @transform_10(%arg0: i32) -> (i32, i32) {
    %c0_i32 = arith.constant 0 : i32
    %c0_i32_0 = arith.constant 0 : i32
    %c0_i32_1 = arith.constant 0 : i32
    return %c0_i32, %c0_i32_0 : i32, i32
  }
  func.func @transform_11(%arg0: i32) -> (i32, i32, i32) {
    %c0_i32 = arith.constant 0 : i32
    %c0_i32_0 = arith.constant 0 : i32
    %c0_i32_1 = arith.constant 0 : i32
    return %arg0, %c0_i32, %c0_i32_0 : i32, i32, i32
  }
}

</mosaic_0001>

<bundles_post_ra>
// kernel: tpu_custom_call.1
= control target key start
LH: loop header
LB: loop body
LE: loop exit
PB: predicated region body
PF: predicated region fallthrough
CT: control target
= control target key end

     0   :  { %s2534_s0 = inlined_call_operand.hbm [shape: bf16[16,32], index: 0, kind: input, shape index: {}]   ;;  %s2535_s1 = inlined_call_operand.hbm [shape: bf16[16,32], index: 1, kind: input, shape index: {}]   ;;  %s2536_s2 = inlined_call_operand.hbm [shape: bf16[32,128], index: 2, kind: input, shape index: {}]   ;;  %s2537_s3 = inlined_call_operand.hbm [shape: bf16[32,128], index: 3, kind: input, shape index: {}]   ;;  %s2538_s4 = inlined_call_operand.hbm [shape: bf16[256,128], index: 4, kind: input, shape index: {}]   ;;  %s2539_s5 = inlined_call_operand.hbm [shape: bf16[128,128], index: 5, kind: input, shape index: {}]   ;;  %s2540_s6 = inlined_call_operand.hbm [shape: bf16[128,128], index: 6, kind: input, shape index: {}]   ;;  %s2541_s7 = inlined_call_operand.hbm [shape: bf16[128,128], index: 7, kind: input, shape index: {}]   ;;  %s2542_s8 = inlined_call_operand.vmem [shape: f32[1,768], index: 8, kind: input, shape index: {}]   ;;  %s2543_s9 = inlined_call_operand.vmem [shape: f32[1,128], index: 9, kind: input, shape index: {}]   ;;  %s2544_s10 = inlined_call_operand.<no memory space> [shape: f32[1,1], index: 10, kind: input, shape index: {}]   ;;  %s2545_s11 = inlined_call_operand.hbm [shape: f32[2,1,8], index: 11, kind: output, shape index: {}]  }
   0x1   :  { %2550 = sst [smem:[#allocation26_spill]] %s2536_s2 }
   0x2   :  { %2551 = sst [smem:[#allocation27_spill]] %s2537_s3 }
   0x3   :  { %2552 = sst [smem:[#allocation28_spill]] %s2538_s4 }
   0x4   :  { %2553 = sst [smem:[#allocation29_spill]] %s2539_s5 }
   0x5   :  { %2554 = sst [smem:[#allocation30_spill]] %s2540_s6 }
   0x6   :  { %2555 = sst [smem:[#allocation31_spill]] %s2541_s7 }
   0x7   :  { %16 = sst [smem:[#allocation2]] %s2544_s10 }
   0x8   :  { %17 = vsyncpa [#allocation4], 0 }
   0x9   :  { %19 = vsyncpa [#allocation4 + $0x1], 0 }
   0xa   :  { %20 = vsyncpa [#allocation7], 0 }
   0xb   :  { %22 = vsyncpa [#allocation7 + $0x1], 0 }
   0xc   :  { %23 = vsyncpa [#allocation10], 0 }
   0xd   :  { %24 = vsyncpa [#allocation13], 0 }
   0xe   :  { %25 = vsyncpa [#allocation16], 0 }
   0xf   :  { %26 = vsyncpa [#allocation5], 0 }
  0x10   :  { %28 = vsyncpa [#allocation5 + $0x1], 0  ;;  %s2175_s19 = smov 0   ;;  %s2177_s20 = smov 0  }
  0x11   :  { %s2179_s21 = smov 0   ;;  %s2181_s22 = smov 0  }
  0x12 LB: > { %s2099_s10 = smov [#allocation8]   ;;  %s2196_s24 = sadd.s32 4294967295, %s2097_s22   ;;  %s2097_s22 = sphi %s2181_s22, %s2588_s22   ;;  %s2093_s21 = sphi %s2179_s21, %s2587_s21   ;;  %s2089_s20 = sphi %s2177_s20, %s2586_s20   ;;  %s2085_s19 = sphi %s2175_s19, %s2585_s19  }
  0x13   : > { %s318_s23 = sshll.u32 %s2099_s10, 4  ;;  %p1422_p0 = scmp.ge.s32.totalorder %s2097_s22, 1  ;;  %s319_s23 = int_to_ptr.vmem [resolvable:$true] %s318_s23 }
  0x14   : > { %p2546_p1 = scmp.eq.s32.totalorder %s2196_s24, 0  ;;  %p306_p2 = scmp.lt.s32.totalorder %s2097_s22, 3 }
  0x15   : > { %s2100_s26 = smov [#allocation9]   ;;  %s2101_s29 = smov [#allocation12]  }
  0x16   : > { %p2201_p3 = pnand %p1422_p0, %p306_p2  ;;  %s331_s27 = sshll.u32 %s2100_s26, 4  ;;  %s2214_s27 = int_to_ptr.vmem [resolvable:$true] %s331_s27 }
  0x17   : > { %s357_s30 = sshll.u32 %s2101_s29, 4  ;;  %s1812_s13 = scalar_lea.vmem %s319_s23, 256  ;;  %s2216_s30 = int_to_ptr.vmem [resolvable:$true] %s357_s30 }
  0x18   : > { %s2556_s25 = scalar_select %p2201_p3, 1, 0 }
  0x19   : > { %p1667_p5 = pneg %p2201_p3  ;;  %p1813_p8 = scmp.ne.s32.totalorder %s319_s23, %s1812_s13 }
  0x1a   : > { %p1820_p11 = scmp.lt.s32.totalorder %s319_s23, %s319_s23  ;;  %p1821_p12 = scmp.lt.s32.totalorder %s1812_s13, %s1812_s13 }
  0x1b   : > { %p2210_p6 = pnand %p1667_p5, %p2546_p1 }
  0x1c   : > { %p1822_p13 = por %p1821_p12, %p1820_p11 }
  0x1d   : > { %p2220_p7 = pneg %p2210_p6 }
  0x1f   : > { %p1815_p9 = pnand %p1813_p8, %p2220_p7 }
  0x21   : > { %p1816_p10 = pneg %p1815_p9 }
  0x23   : > { %p1823_p0 = pnand %p1822_p13, %p1816_p10 }
  0x25   : > { %1826 = shalt.err (!%p1823_p0)
}
  0x26   : > { %s2102_s14 = smov 64   ;;  %s2103_s15 = smov 4  }
  0x27   : > { %s2559_s2 = sld [smem:[#allocation26_spill]]  ;;  %s1838_s18 = scalar_lea.vmem %s2214_s27, 256 }
  0x28   : > { %p1839_p2 = scmp.ne.s32.totalorder %s2214_s27, %s1838_s18  ;;  %p1846_p9 = scmp.lt.s32.totalorder %s2214_s27, %s2214_s27 }
  0x29   : > { %p1847_p10 = scmp.lt.s32.totalorder %s1838_s18, %s1838_s18 }
  0x2a   : > { %p1841_p5 = pnand %p1839_p2, %p2220_p7 }
  0x2b   : > { %p1848_p11 = por %p1847_p10, %p1846_p9 }
  0x2c   : > { %p1842_p8 = pneg %p1841_p5 }
  0x2d   : > { %1670 = dma.hbm_to_vmem [thread:$0]  (!%p2210_p6), %s2559_s2, 256, %s319_s23, [#allocation7], %s2102_s14, %s2102_s14, %s2103_s15  }
  0x2e   : > { %p1849_p12 = pnand %p1848_p11, %p1842_p8 }
  0x30   : > { %1852 = shalt.err (!%p1849_p12)
}
  0x31   : > { %s2560_s3 = sld [smem:[#allocation27_spill]]  ;;  %s1864_s23 = scalar_lea.vmem %s2216_s30, 1024 }
  0x32   : > { %p1865_p13 = scmp.ne.s32.totalorder %s2216_s30, %s1864_s23  ;;  %p1872_p5 = scmp.lt.s32.totalorder %s2216_s30, %s2216_s30 }
  0x33   : > { %p1873_p8 = scmp.lt.s32.totalorder %s1864_s23, %s1864_s23 }
  0x34   : > { %p1867_p0 = pnand %p1865_p13, %p2220_p7 }
  0x35   : > { %p1874_p9 = por %p1873_p8, %p1872_p5 }
  0x36   : > { %p1868_p2 = pneg %p1867_p0 }
  0x37   : > { %1673 = dma.hbm_to_vmem [thread:$0]  (!%p2210_p6), %s2560_s3, 256, %s2214_s27, [#allocation10], %s2102_s14, %s2102_s14, %s2103_s15  }
  0x38   : > { %p1875_p10 = pnand %p1874_p9, %p1868_p2 }
  0x3a   : > { %1878 = shalt.err (!%p1875_p10)
}
  0x3b   : > { %s2561_s5 = sld [smem:[#allocation29_spill]]  ;;  %s2104_s27 = smov [#allocation11]  }
  0x3c   : > { %s344_s16 = sshll.u32 %s2104_s27, 4  ;;  %s2105_s17 = smov [#allocation14]   ;;  %s345_s16 = int_to_ptr.vmem [resolvable:$true] %s344_s16 }
  0x3d   : > { %s370_s18 = sshll.u32 %s2105_s17, 4  ;;  %s1890_s10 = scalar_lea.vmem %s345_s16, 2048  ;;  %s371_s18 = int_to_ptr.vmem [resolvable:$true] %s370_s18 }
  0x3e   : > { %p1891_p11 = scmp.ne.s32.totalorder %s345_s16, %s1890_s10  ;;  %p1898_p0 = scmp.lt.s32.totalorder %s345_s16, %s345_s16 }
  0x3f   : > { %p1899_p2 = scmp.lt.s32.totalorder %s1890_s10, %s1890_s10 }
  0x40   : > { %p1893_p12 = pnand %p1891_p11, %p2220_p7 }
  0x41   : > { %1679 = dma.hbm_to_vmem [thread:$0]  (!%p2210_p6), %s2561_s5, 1024, %s2216_s30, [#allocation13], %s2102_s14, %s2102_s14, %s2103_s15  }
  0x42   : > { %p1894_p13 = pneg %p1893_p12  ;;  %p1900_p5 = por %p1899_p2, %p1898_p0 }
  0x44   : > { %p1901_p8 = pnand %p1900_p5, %p1894_p13 }
  0x46   : > { %1904 = shalt.err (!%p1901_p8)
}
  0x47   : > { %s2562_s4 = sld [smem:[#allocation28_spill]]  ;;  %s1916_s23 = scalar_lea.vmem %s371_s18, 1024 }
  0x48   : > { %p1917_p9 = scmp.ne.s32.totalorder %s371_s18, %s1916_s23  ;;  %p1924_p12 = scmp.lt.s32.totalorder %s371_s18, %s371_s18 }
  0x49   : > { %p1925_p0 = scmp.lt.s32.totalorder %s1916_s23, %s1916_s23 }
  0x4a   : > { %p1919_p10 = pnand %p1917_p9, %p2220_p7 }
  0x4b   : > { %p1926_p13 = por %p1925_p0, %p1924_p12 }
  0x4c   : > { %p1920_p11 = pneg %p1919_p10 }
  0x4d   : > { %1676 = dma.hbm_to_vmem [thread:$0]  (!%p2210_p6), %s2562_s4, 2048, %s345_s16, [#allocation10], %s2102_s14, %s2102_s14, %s2103_s15  }
  0x4e   : > { %p1927_p2 = pnand %p1926_p13, %p1920_p11 }
  0x50   : > { %1930 = shalt.err (!%p1927_p2)
}
  0x51   : > { %s2563_s6 = sld [smem:[#allocation30_spill]]  ;;  %s2106_s27 = smov [#allocation15]  }
  0x52   : > { %s383_s16 = sshll.u32 %s2106_s27, 4  ;;  %s384_s16 = int_to_ptr.vmem [resolvable:$true] %s383_s16 }
  0x53   : > { %s1942_s17 = scalar_lea.vmem %s384_s16, 1024  ;;  %p1950_p10 = scmp.lt.s32.totalorder %s384_s16, %s384_s16 }
  0x54   : > { %p1943_p5 = scmp.ne.s32.totalorder %s384_s16, %s1942_s17  ;;  %p1951_p11 = scmp.lt.s32.totalorder %s1942_s17, %s1942_s17 }
  0x56   : > { %p1945_p8 = pnand %p1943_p5, %p2220_p7  ;;  %p1952_p12 = por %p1951_p11, %p1950_p10 }
  0x57   : > { %1682 = dma.hbm_to_vmem [thread:$0]  (!%p2210_p6), %s2563_s6, 1024, %s371_s18, [#allocation13], %s2102_s14, %s2102_s14, %s2103_s15  }
  0x58   : > { %p1946_p9 = pneg %p1945_p8 }
  0x5a   : > { %p1953_p0 = pnand %p1952_p12, %p1946_p9 }
  0x5c   : > { %1956 = shalt.err (!%p1953_p0)
}
  0x5d   : > { %s2564_s7 = sld [smem:[#allocation31_spill]]  ;;  %s1421_s28 = sadd.s32 4294967294, %s2097_s22  }
  0x5e   : > { %s2296_s12 = sadd.s32 1, %s2097_s22   ;;  %s41_s26 = sadd.s32 1, %s2093_s21 }
  0x5f   : > { %s38_s30 = ssub.s32 %s2097_s22, %s2296_s12  ;;  %p48_p13 = scmp.ne.s32.totalorder %s2093_s21, %s2089_s20 }
  0x60   : > { %p39_p7 = scmp.eq.s32.totalorder %s38_s30, 0  ;;  %p49_p2 = scmp.eq.s32.totalorder %s2097_s22, 0 }
  0x61   : > { %p54_p5 = scmp.ne.s32.totalorder %s2089_s20, %s2085_s19  ;;  %p293_p9 = scmp.eq.s32.totalorder %s2196_s24, 1 }
  0x62   : > { %s2307_s23 = scalar_select %p39_p7, %s2093_s21, %s41_s26  }
  0x63   : > { %1685 = dma.hbm_to_vmem [thread:$0]  (!%p2210_p6), %s2564_s7, 1024, %s384_s16, [#allocation16], %s2102_s14, %s2102_s14, %s2103_s15  }
  0x64   : > { %2565 = sst [smem:[#allocation25_spill]] %s2307_s23  ;;  %p2309_p8 = por %p49_p2, %p48_p13 }
  0x65   : > { %p2315_p6 = por %p2546_p1, %p54_p5  ;;  %p299_p10 = scmp.eq.s32.totalorder %s1421_s28, 1 }
  0x66   : > { %p1703_p11 = scmp.lt.s32.totalorder %s2097_s22, 2  ;;  %s406_s15 = sand.u32 1, %s2093_s21  }
  0x67   : > { %s2567_s14 = scalar_select %p2315_p6, 1, 0 }
  0x68   : > { %p2322_p12 = por %p293_p9, %p48_p13  ;;  %p2326_p0 = por %p299_p10, %p54_p5 }
  0x69   : > { %s2330_s16 = sshll.u32 %s406_s15, 2  ;;  %s1431_s17 = sshll.u32 %s2097_s22, 6 }
  0x6a   : > { %s2568_s13 = scalar_select %p2322_p12, 1, 0 }
  0x6b   : > { %s2569_s27 = scalar_select %p2326_p0, 1, 0 }
  0x6c   : > { %s2336_s30 = scalar_lea.hbm %s2534_s0, %s1431_s17  ;;  %s410_s28 = scalar_lea.vmem [#allocation3], %s2330_s16 }
  0x6d   : > { %s417_s26 = sshll.u32 %s410_s28, 4  ;;  %p2343_p7 = pnand %p1703_p11, %p2309_p8  ;;  %s2339_s26 = int_to_ptr.vmem [resolvable:$true] %s417_s26 }
  0x6e   : > { %s2350_s10 = scalar_lea.hbm %s2535_s1, %s1431_s17  ;;  %s424_s18 = sand.u32 1, %s2097_s22  }
  0x6f   : > { %s407_s5 = scalar_lea.sflag [#allocation4], %s406_s15  ;;  %s1957_s6 = scalar_lea.hbm %s2336_s30, 64 }
  0x70   : > { %p1958_p13 = scmp.ne.s32.totalorder %s2336_s30, %s1957_s6  ;;  %p1959_p2 = pneg %p2343_p7 }
  0x71   : > { %s1962_s7 = scalar_lea.hbm %s2534_s0, 128  ;;  %p1963_p9 = scmp.lt.s32.totalorder %s2336_s30, %s2534_s0 }
  0x72   : > { %p1960_p5 = pnand %p1959_p2, %p1958_p13  ;;  %p1964_p10 = scmp.lt.s32.totalorder %s1962_s7, %s1957_s6 }
  0x74   : > { %p1961_p8 = pneg %p1960_p5  ;;  %p1965_p11 = por %p1964_p10, %p1963_p9 }
  0x76   : > { %p1966_p4 = pnand %p1965_p11, %p1961_p8 }
  0x78   : > { %1969 = shalt.err (!%p1966_p4)
}
  0x79   : > { %s1970_s4 = scalar_lea.vmem %s2339_s26, 64  ;;  %s2107_s15 = smov [#allocation3]  }
  0x7a   : > { %p1971_p1 = scmp.ne.s32.totalorder %s2339_s26, %s1970_s4  ;;  %s1975_s17 = sshll.u32 %s2107_s15, 4  ;;  %s1976_s17 = int_to_ptr.vmem [resolvable:$false] %s1975_s17 }
  0x7b   : > { %s1977_s29 = scalar_lea.vmem %s1976_s17, 128  ;;  %p1978_p0 = scmp.lt.s32.totalorder %s2339_s26, %s1976_s17 }
  0x7c   : > { %p1973_p13 = pnand %p1971_p1, %p1959_p2  ;;  %p1979_p12 = scmp.lt.s32.totalorder %s1977_s29, %s1970_s4 }
  0x7e   : > { %p1974_p5 = pneg %p1973_p13  ;;  %p1980_p6 = por %p1979_p12, %p1978_p0 }
  0x80   : > { %p1981_p9 = pnand %p1980_p6, %p1974_p5 }
  0x82   : > { %1984 = shalt.err (!%p1981_p9)
}
  0x83   : > { %1689 = dma.hbm_to_vmem [thread:$0]  (!%p2343_p7), %s2336_s30, 64, %s2339_s26, %s407_s5  }
  0x84   : > { %s428_s6 = scalar_lea.vmem [#allocation6], %s2330_s16  ;;  %s425_s23 = scalar_lea.sflag [#allocation7], %s424_s18 }
  0x85   : > { %s435_s7 = sshll.u32 %s428_s6, 4  ;;  %s1985_s28 = scalar_lea.hbm %s2350_s10, 64  ;;  %s436_s7 = int_to_ptr.vmem [resolvable:$true] %s435_s7 }
  0x86   : > { %p1986_p1 = scmp.ne.s32.totalorder %s2350_s10, %s1985_s28  ;;  %s1990_s15 = scalar_lea.hbm %s2535_s1, 128 }
  0x87   : > { %p1991_p12 = scmp.lt.s32.totalorder %s2350_s10, %s2535_s1  ;;  %p1992_p0 = scmp.lt.s32.totalorder %s1990_s15, %s1985_s28 }
  0x88   : > { %p1988_p4 = pnand %p1986_p1, %p1959_p2 }
  0x89   : > { %p1993_p8 = por %p1992_p0, %p1991_p12 }
  0x8a   : > { %p1989_p6 = pneg %p1988_p4 }
  0x8c   : > { %p1994_p10 = pnand %p1993_p8, %p1989_p6 }
  0x8e   : > { %1997 = shalt.err (!%p1994_p10)
}
  0x8f   : > { %s1998_s5 = scalar_lea.vmem %s436_s7, 64  ;;  %s2108_s16 = smov [#allocation6]  }
  0x90   : > { %p1999_p11 = scmp.ne.s32.totalorder %s436_s7, %s1998_s5  ;;  %s2003_s30 = sshll.u32 %s2108_s16, 4  ;;  %s2004_s30 = int_to_ptr.vmem [resolvable:$false] %s2003_s30 }
  0x91   : > { %s2005_s26 = scalar_lea.vmem %s2004_s30, 128  ;;  %p2006_p9 = scmp.lt.s32.totalorder %s436_s7, %s2004_s30 }
  0x92   : > { %p2001_p13 = pnand %p1999_p11, %p1959_p2  ;;  %p2007_p1 = scmp.lt.s32.totalorder %s2005_s26, %s1998_s5 }
  0x94   : > { %p2002_p5 = pneg %p2001_p13  ;;  %p2008_p4 = por %p2007_p1, %p2006_p9 }
  0x96   : > { %p2009_p3 = pnand %p2008_p4, %p2002_p5 }
  0x98   : > { %2012 = shalt.err (!%p2009_p3)
}
  0x99   : > { %1692 = dma.hbm_to_vmem [thread:$0]  (!%p2343_p7), %s2350_s10, 64, %s436_s7, %s425_s23  }
  0x9a   : > { %p2571_p6 = scmp.ne.s32.totalorder %s2556_s25, 0 }
  0x9b   : > { %s2401_s18 = sand.u32 (!%p2571_p6), 1, %s2089_s20   ;;  %p2572_p2 = scmp.ne.s32.totalorder (!%p2571_p6), %s2567_s14, 0 }
  0x9c   : > { %444 = sbr.rel (%p2571_p6) target bundleno = 1429 (0x595), region = 64  ;;  %s1435_s6 = sshll.u32 (!%p2571_p6), %s2401_s18, 2 }
  0x9d   : > { %s447_s28 = scalar_lea.sflag (!%p2571_p6), [#allocation4], %s2401_s18  ;;  %s450_s3 = scalar_lea.vmem (!%p2571_p6), [#allocation3], %s1435_s6 }
  0xa1   : > { %2056 = dma.done.wait (%p2572_p2), %s447_s28, 64  }
  0xa2   : > { %2058 = vsyncadd (%p2572_p2), %s447_s28, 4294967232  ;;  %s455_s2 = sand.u32 1, %s2196_s24   ;;  %s459_s25 = scalar_lea.vmem [#allocation6], %s1435_s6 }
  0xa3   : > { %s456_s10 = scalar_lea.sflag [#allocation7], %s455_s2 }
  0xa4   : > { %2060 = dma.done.wait (%p2572_p2), %s456_s10, 64  }
  0xa5   : > { %2062 = vsyncadd (%p2572_p2), %s456_s10, 4294967232  ;;  %p2573_p3 = scmp.eq.s32.totalorder %s2196_s24, 0 }
  0xa7   : > { %2064 = dma.done.wait (%p2573_p3), [#allocation7], 256   ;;  %p2574_p7 = pmov %p2573_p3 }
  0xa8   : > { %p2575_p12 = pmov %p2573_p3 }
  0xa9   : > { %2066 = vsyncadd (%p2574_p7), [#allocation7], 4294967040 }
  0xaa   : > { %2068 = dma.done.wait (%p2575_p12), [#allocation10], 2304   ;;  %p2576_p0 = pmov %p2573_p3 }
  0xac   : > { %2070 = vsyncadd (%p2576_p0), [#allocation10], 4294964992  ;;  %p2577_p8 = pmov %p2576_p0 }
  0xad   : > { %p2578_p10 = pmov %p2576_p0 }
  0xae   : > { %2072 = dma.done.wait (%p2577_p8), [#allocation13], 2048  }
  0xaf   : > { %2074 = vsyncadd (%p2578_p10), [#allocation13], 4294965248  ;;  %p2579_p11 = pmov %p2576_p0 }
  0xb0   : > { %p2580_p13 = pmov %p2576_p0 }
  0xb1   : > { %2076 = dma.done.wait (%p2579_p11), [#allocation16], 1024  }
  0xb2   : > { %2078 = vsyncadd (%p2580_p13), [#allocation16], 4294966272  ;;  %v2109_v0 = vmov 0.0   ;;  %vm2110_vm0 = vmmov 0   ;;  %v1753_v1 = vld [vmem:[#allocation8 + $0x8] sm:$0xff]   ;;  %v1754_v2 = vld [vmem:[#allocation9 + $0x8] sm:$0xff]  }
  0xb3   : > { %1556 = vmatprep.subr.bf16.mxu0 %v2109_v0  ;;  %1564 = vmatprep.subr.bf16.mxu1 %v2109_v0  ;;  %v1755_v3 = vld [vmem:[#allocation8] sm:$0xff]   ;;  %v1756_v4 = vld [vmem:[#allocation9] sm:$0xff]   ;;  %v596_v6 = vld [vmem:[%s459_s25] sm:$0xf]  ;;  %vm551_vm1 = vcmask 261120   ;;  %s1182_s2 = sld [smem:[#allocation2]] }
  0xb4   : > { %1560 = vmatprep.mubr.msk.bf16.mxu0 %vm2110_vm0, %v2109_v0  ;;  %1568 = vmatprep.mubr.msk.bf16.mxu1 %vm2110_vm0, %v2109_v0  ;;  %v527_v5 = vld [vmem:[%s450_s3] sm:$0xf]  ;;  %v1757_v7 = vld [vmem:[#allocation11 + $0x78] sm:$0xff]   ;;  %v1761_v11 = vld [vmem:[#allocation11 + $0x68] sm:$0xff]   ;;  %s1496_s10 = sshll.u32 %s2196_s24, 4  ;;  %s525_s25 = scalar_lea.vmem [#allocation17], %s2401_s18 }
  0xb5   : > { %1557 = vmatpush3.bf16.msra.mxu0 %v1753_v1  ;;  %1565 = vmatpush3.bf16.msra.mxu1 %v1754_v2  ;;  %v1758_v8 = vld [vmem:[#allocation11 + $0x38] sm:$0xff]   ;;  %v1759_v9 = vld [vmem:[#allocation11 + $0x70] sm:$0xff]   ;;  %v1762_v12 = vld [vmem:[#allocation11 + $0x28] sm:$0xff]   ;;  %s1275_s14 = sshll.u32 %s525_s25, 4  ;;  %vm1260_vm2 = vcmask 57344   ;;  %s2497_s4 = scalar_lea.hbm %s2545_s11, %s1496_s10  ;;  %s1276_s14 = int_to_ptr.vmem [resolvable:$true] %s1275_s14 }
  0xb6   : > { %1558 = vmatprep.subr.bf16.mxu0 %v2109_v0  ;;  %1566 = vmatprep.subr.bf16.mxu1 %v2109_v0  ;;  %v1760_v10 = vld [vmem:[#allocation11 + $0x30] sm:$0xff]   ;;  %v1763_v13 = vld [vmem:[#allocation11 + $0x60] sm:$0xff]   ;;  %v1765_v15 = vld [vmem:[#allocation11 + $0x58] sm:$0xff]   ;;  %s1263_s15 = scalar_lea.sflag [#allocation5], %s2401_s18  ;;  %s2013_s17 = scalar_lea.vmem %s1276_s14, 16 }
  0xb7   : > { %v1764_v14 = vld [vmem:[#allocation11 + $0x20] sm:$0xff]   ;;  %v1766_v16 = vld [vmem:[#allocation11 + $0x18] sm:$0xff]   ;;  %v1767_v17 = vld [vmem:[#allocation11 + $0x50] sm:$0xff]   ;;  %p2014_p5 = scmp.ne.s32.totalorder %s1276_s14, %s2013_s17  ;;  %p2581_p9 = scmp.ne.s32.totalorder %s2568_s13, 0 }
  0xb8   : > { %v1768_v18 = vld [vmem:[#allocation11 + $0x10] sm:$0xff]   ;;  %v1769_v19 = vld [vmem:[#allocation11 + $0x48] sm:$0xff]   ;;  %v1771_v21 = vld [vmem:[#allocation11 + $0x40] sm:$0xff]   ;;  %s2111_s29 = smov [#allocation17]  }
  0xb9   : > { %1559 = vmatpush3.bf16.msra.mxu0 %v1755_v3  ;;  %1567 = vmatpush3.bf16.msra.mxu1 %v1756_v4  ;;  %v1770_v20 = vld [vmem:[#allocation11 + $0x8] sm:$0xff]   ;;  %v1772_v22 = vld [vmem:[#allocation11] sm:$0xff]   ;;  %v1773_v23 = vld [vmem:[#allocation12 + $0x38] sm:$0xff]   ;;  %p2015_p1 = pnand %p2014_p5, %p2581_p9  ;;  %s2017_s5 = sshll.u32 %s2111_s29, 4  ;;  %s2018_s5 = int_to_ptr.vmem [resolvable:$false] %s2017_s5 }
  0xba   : > { %1505 = vmatprep.subr.bf16.mxu0 %v1757_v7  ;;  %1572 = vmatprep.subr.bf16.mxu1 %v2109_v0  ;;  %v1774_v24 = vld [vmem:[#allocation12 + $0x30] sm:$0xff]   ;;  %v1775_v25 = vld [vmem:[#allocation12 + $0x28] sm:$0xff]   ;;  %v1776_v26 = vld [vmem:[#allocation12 + $0x20] sm:$0xff]   ;;  %s2019_s24 = scalar_lea.vmem %s2018_s5, 32  ;;  %p2020_p6 = scmp.lt.s32.totalorder %s1276_s14, %s2018_s5 }
  0xbb   : > { %v1777_v27 = vld [vmem:[#allocation12 + $0x18] sm:$0xff]   ;;  %v1443_v28 = vld [vmem:[%s2542_s8] ss:$0 sm:$0xff]  ;;  %v1447_v29 = vld [vmem:[%s2542_s8 + $0x1] ss:$0 sm:$0xff]  ;;  %p2016_p4 = pneg %p2015_p1  ;;  %p2021_p2 = scmp.lt.s32.totalorder %s2019_s24, %s2013_s17 }
  0xbc   : > { %1561 = vmatmul.mubr.msk.bf16.vlgmr.msra.gmra.mxu0 %vm551_vm1, %v527_v5  ;;  %1569 = vmatmul.mubr.msk.bf16.vlgmr.msra.gmra.mxu1 %vm551_vm1, %v596_v6  ;;  %v1778_v44 = vld [vmem:[#allocation12 + $0x10] sm:$0xff]   ;;  %v1779_v45 = vld [vmem:[#allocation12 + $0x8] sm:$0xff]   ;;  %v1780_v46 = vld [vmem:[#allocation12] sm:$0xff]  }
  0xbd   : > { %1506 = vmatpush3.bf16.msra.mxu0 %v1758_v8  ;;  %1588 = vmatprep.mubr.msk.bf16.mxu1 %vm2110_vm0, %v2109_v0  ;;  %v1781_v47 = vld [vmem:[#allocation14 + $0x38] sm:$0xff]   ;;  %v1782_v48 = vld [vmem:[#allocation14 + $0x30] sm:$0xff]   ;;  %v1783_v49 = vld [vmem:[#allocation14 + $0x28] sm:$0xff]   ;;  %p2022_p3 = por %p2021_p2, %p2020_p6 }
  0xbe   : > { %1507 = vmatprep.subr.bf16.mxu0 %v1759_v9  ;;  %1573 = vmatpush3.bf16.msra.mxu1 %v1773_v23  ;;  %v1784_v50 = vld [vmem:[#allocation14 + $0x20] sm:$0xff]   ;;  %v1785_v51 = vld [vmem:[#allocation14 + $0x18] sm:$0xff]   ;;  %v1786_v52 = vld [vmem:[#allocation14 + $0x10] sm:$0xff]  }
  0xbf   : > { %1574 = vmatprep.subr.bf16.mxu1 %v2109_v0  ;;  %v1451_v54 = vld [vmem:[%s2542_s8 + $0x2] ss:$0 sm:$0xff]  ;;  %v1787_v62 = vld [vmem:[#allocation14 + $0x8] sm:$0xff]   ;;  %v1788_v63 = vld [vmem:[#allocation14] sm:$0xff]   ;;  %p2023_p7 = pnand %p2022_p3, %p2016_p4 }
  0xc0   : > { %v1789_v1 = vld [vmem:[#allocation15 + $0x38] sm:$0xff]   ;;  %v1790_v2 = vld [vmem:[#allocation15 + $0x30] sm:$0xff]   ;;  %v1791_v3 = vld [vmem:[#allocation15 + $0x28] sm:$0xff]  }
  0xc1   : > { %1508 = vmatpush3.bf16.msra.mxu0 %v1760_v10  ;;  %v1792_v4 = vld [vmem:[#allocation15 + $0x20] sm:$0xff]   ;;  %v1793_v5 = vld [vmem:[#allocation15 + $0x18] sm:$0xff]   ;;  %v1794_v6 = vld [vmem:[#allocation15 + $0x10] sm:$0xff]  }
  0xc2   : > { %1509 = vmatprep.subr.bf16.mxu0 %v1761_v11  ;;  %1575 = vmatpush3.bf16.msra.mxu1 %v1774_v24  ;;  %v1468_v7 = vld [vmem:[%s2542_s8 + $0x3] ss:$0 sm:$0xff] }
  0xc3   : > { %1576 = vmatprep.subr.bf16.mxu1 %v2109_v0 }
  0xc5   : > { %1510 = vmatpush3.bf16.msra.mxu0 %v1762_v12 }
  0xc6   : > { %1511 = vmatprep.subr.bf16.mxu0 %v1763_v13  ;;  %1577 = vmatpush3.bf16.msra.mxu1 %v1775_v25  ;;  %v1486_v25 = vld [vmem:[%s2542_s8 + $0x5] ss:$0 sm:$0xff] }
  0xc7   : > { %1578 = vmatprep.subr.bf16.mxu1 %v2109_v0 }
  0xc9   : > { %1512 = vmatpush3.bf16.msra.mxu0 %v1764_v14 }
  0xca   : > { %1513 = vmatprep.subr.bf16.mxu0 %v1765_v15  ;;  %1579 = vmatpush3.bf16.msra.mxu1 %v1776_v26  ;;  %v1795_v15 = vld [vmem:[#allocation15 + $0x8] sm:$0xff]  }
  0xcb   : > { %1580 = vmatprep.subr.bf16.mxu1 %v2109_v0 }
  0xcd   : > { %1514 = vmatpush3.bf16.msra.mxu0 %v1766_v16  ;;  %v1796_v16 = vld [vmem:[#allocation15] sm:$0xff]  }
  0xce   : > { %1515 = vmatprep.subr.bf16.mxu0 %v1767_v17  ;;  %1581 = vmatpush3.bf16.msra.mxu1 %v1777_v27  ;;  %v1477_v17 = vld [vmem:[%s2542_s8 + $0x4] ss:$0 sm:$0xff] }
  0xcf   : > { %1582 = vmatprep.subr.bf16.mxu1 %v2109_v0 }
  0xd1   : > { %1516 = vmatpush3.bf16.msra.mxu0 %v1768_v18 }
  0xd2   : > { %1517 = vmatprep.subr.bf16.mxu0 %v1769_v19  ;;  %1583 = vmatpush3.bf16.msra.mxu1 %v1778_v44 }
  0xd3   : > { %1584 = vmatprep.subr.bf16.mxu1 %v2109_v0 }
  0xd5   : > { %1518 = vmatpush3.bf16.msra.mxu0 %v1770_v20 }
  0xd6   : > { %1519 = vmatprep.subr.bf16.mxu0 %v1771_v21  ;;  %1585 = vmatpush3.bf16.msra.mxu1 %v1779_v45 }
  0xd7   : > { %1586 = vmatprep.subr.bf16.mxu1 %v2109_v0 }
  0xd9   : > { %1520 = vmatpush3.bf16.msra.mxu0 %v1772_v22 }
  0xda   : > { %1592 = vmatprep.subr.bf16.mxu0 %v2109_v0  ;;  %1587 = vmatpush3.bf16.msra.mxu1 %v1780_v46 }
  0xdb   : > { %1612 = vmatprep.subr.bf16.mxu1 %v2109_v0 }
 0x17c   : > { %v589_v30 = vpop.f32.mrf.mxu0  ;;  %v657_v32 = vpop.f32.mrf.mxu1 }
 0x17d   : > { %v590_v31 = vadd.f32 %v1443_v28, %v589_v30  ;;  %v658_v33 = vadd.f32 %v1447_v29, %v657_v32  ;;  %v1181_v30 = vld [vmem:[%s2543_s9] sm:$0x1]  ;;  %v1183_v32 = vstv %s1182_s2 }
 0x17e   : > { %v1562_v34 = vpop.f32.mrf.mxu0  ;;  %v1570_v36 = vpop.f32.mrf.mxu1 }
 0x17f   : > { %v595_v35 = vmax.f32 %v590_v31, 0.0  ;;  %v663_v37 = vmax.f32 %v658_v33, 0.0 }
 0x180   : > { %v592_v38 = vpop.f32.mrf.mxu0  ;;  %v660_v40 = vpop.f32.mrf.mxu1 }
 0x181   : > { %v664_v39 = vpack.c.bf16 %v595_v35, %v595_v35  ;;  %v665_v41 = vpack.c.bf16 %v663_v37, %v663_v37 }
 0x182   : > { %v1563_v42 = vpop.f32.mrf.mxu0  ;;  %v1571_v43 = vpop.f32.mrf.mxu1 }
 0x183   : > { %833 = vmatprep.mubr.bf16.mxu0 %v665_v41 }
 0x184   : > { %834 = vmatmul.mubr.bf16.vlgmr.msra.gmra.mxu0 %v664_v39 }
 0x185   : > { %1608 = vmatprep.mubr.msk.bf16.mxu0 %vm2110_vm0, %v2109_v0  ;;  %1593 = vmatpush3.bf16.msra.mxu0 %v1781_v47 }
 0x186   : > { %1594 = vmatprep.subr.bf16.mxu0 %v2109_v0 }
 0x189   : > { %1595 = vmatpush3.bf16.msra.mxu0 %v1782_v48 }
 0x18a   : > { %1596 = vmatprep.subr.bf16.mxu0 %v2109_v0 }
 0x18d   : > { %1597 = vmatpush3.bf16.msra.mxu0 %v1783_v49 }
 0x18e   : > { %1598 = vmatprep.subr.bf16.mxu0 %v2109_v0 }
 0x191   : > { %1599 = vmatpush3.bf16.msra.mxu0 %v1784_v50 }
 0x192   : > { %1600 = vmatprep.subr.bf16.mxu0 %v2109_v0 }
 0x195   : > { %1601 = vmatpush3.bf16.msra.mxu0 %v1785_v51 }
 0x196   : > { %1602 = vmatprep.subr.bf16.mxu0 %v2109_v0 }
 0x199   : > { %1603 = vmatpush3.bf16.msra.mxu0 %v1786_v52 }
 0x19a   : > { %1604 = vmatprep.subr.bf16.mxu0 %v2109_v0 }
 0x19d   : > { %1605 = vmatpush3.bf16.msra.mxu0 %v1787_v62 }
 0x19e   : > { %1606 = vmatprep.subr.bf16.mxu0 %v2109_v0 }
 0x1a1   : > { %1607 = vmatpush3.bf16.msra.mxu0 %v1788_v63 }
 0x1a2   : > { %1632 = vmatprep.subr.mxu0 %v2109_v0 }
 0x244   : > { %v1521_v53 = vpop.f32.mrf.mxu0 }
 0x246   : > { %v1522_v55 = vpop.f32.mrf.mxu0 }
 0x247   : > { %v1523_v56 = vadd.f32 %v1522_v55, %v1521_v53 }
 0x248   : > { %v1524_v57 = vpop.f32.mrf.mxu0 }
 0x249   : > { %v836_v58 = vadd.f32 %v1523_v56, %v1451_v54 }
 0x24a   : > { %v1525_v59 = vpop.f32.mrf.mxu0 }
 0x24b   : > { %v841_v60 = vmax.f32 %v836_v58, 0.0 }
 0x24d   : > { %v842_v61 = vpack.c.bf16 %v841_v60, %v841_v60 }
 0x24f   : > { %1589 = vmatmul.mubr.bf16.vlgmr.msra.gmra.mxu1 %v842_v61 }
 0x250   : > { %1628 = vmatprep.mubr.msk.bf16.mxu1 %vm2110_vm0, %v2109_v0  ;;  %1613 = vmatpush3.bf16.msra.mxu1 %v1789_v1 }
 0x251   : > { %1614 = vmatprep.subr.bf16.mxu1 %v2109_v0 }
 0x254   : > { %1615 = vmatpush3.bf16.msra.mxu1 %v1790_v2 }
 0x255   : > { %1616 = vmatprep.subr.bf16.mxu1 %v2109_v0 }
 0x258   : > { %1617 = vmatpush3.bf16.msra.mxu1 %v1791_v3 }
 0x259   : > { %1618 = vmatprep.subr.bf16.mxu1 %v2109_v0 }
 0x25c   : > { %1619 = vmatpush3.bf16.msra.mxu1 %v1792_v4 }
 0x25d   : > { %1620 = vmatprep.subr.bf16.mxu1 %v2109_v0 }
 0x260   : > { %1621 = vmatpush3.bf16.msra.mxu1 %v1793_v5 }
 0x261   : > { %1622 = vmatprep.subr.bf16.mxu1 %v2109_v0 }
 0x264   : > { %1623 = vmatpush3.bf16.msra.mxu1 %v1794_v6 }
 0x265   : > { %1624 = vmatprep.subr.bf16.mxu1 %v2109_v0 }
 0x268   : > { %1625 = vmatpush3.bf16.msra.mxu1 %v1795_v15 }
 0x269   : > { %1626 = vmatprep.subr.bf16.mxu1 %v2109_v0 }
 0x26c   : > { %1627 = vmatpush3.bf16.msra.mxu1 %v1796_v16 }
 0x30f   : > { %v948_v8 = vpop.f32.mrf.mxu1 }
 0x310   : > { %v949_v9 = vadd.f32 %v1468_v7, %v948_v8 }
 0x311   : > { %v1590_v10 = vpop.f32.mrf.mxu1 }
 0x312   : > { %v954_v11 = vmax.f32 %v949_v9, 0.0 }
 0x313   : > { %v951_v12 = vpop.f32.mrf.mxu1 }
 0x314   : > { %v955_v13 = vpack.c.bf16 %v954_v11, %v954_v11 }
 0x315   : > { %v1591_v14 = vpop.f32.mrf.mxu1 }
 0x316   : > { %1609 = vmatmul.mubr.bf16.vlgmr.msra.gmra.mxu0 %v955_v13 }
 0x317   : > { %1634 = vmatprep.mubr.msk.f32.mxu0 %vm2110_vm0, %v2109_v0 }
 0x3d6   : > { %v1061_v18 = vpop.f32.mrf.mxu0 }
 0x3d7   : > { %v1062_v19 = vadd.f32 %v1477_v17, %v1061_v18 }
 0x3d8   : > { %v1610_v20 = vpop.f32.mrf.mxu0 }
 0x3d9   : > { %v1067_v21 = vmax.f32 %v1062_v19, 0.0 }
 0x3da   : > { %v1064_v22 = vpop.f32.mrf.mxu0 }
 0x3db   : > { %v1068_v23 = vpack.c.bf16 %v1067_v21, %v1067_v21 }
 0x3dc   : > { %v1611_v24 = vpop.f32.mrf.mxu0 }
 0x3dd   : > { %1629 = vmatmul.mubr.bf16.vlgmr.msra.gmra.mxu1 %v1068_v23 }
 0x49d   : > { %v1174_v26 = vpop.f32.mrf.mxu1 }
 0x49e   : > { %v1175_v0 = vadd.f32 %v1486_v25, %v1174_v26 }
 0x49f   : > { %v1630_v27 = vpop.f32.mrf.mxu1 }
 0x4a0   : > { %v1180_v28 = vmax.f32 %v1175_v0, 0.0 }
 0x4a1   : > { %v1177_v29 = vpop.f32.mrf.mxu1 }
 0x4a2   : > { %1633 = vmatpush3.xpose.msra.mxu0 %v1180_v28 }
 0x4a3   : > { %v1631_v31 = vpop.f32.mrf.mxu1 }
 0x4a5   : > { %1635 = vmatmul.mubr.f32.vlgmr.msra.gmra.mxu0 %v1181_v30 }
 0x565   : > { %v1250_v33 = vpop.f32.mrf.mxu0 }
 0x566   : > { %v1251_v34 = vadd.f32 %v1250_v33, %v1183_v32 }
 0x567   : > { %v1636_v35 = vpop.f32.mrf.mxu0 }
 0x568   : > { %v1495_v36 = vmul.f32 -1.442695, %v1251_v34 }
 0x56a   : > { %1797 = vpow2.f32 %v1495_v36 }
 0x577   : > { %v1798_v37 = vpop.eup %1797 }
 0x578   : > { %v1257_v38 = vadd.f32 1.0, %v1798_v37 }
 0x57a   : > { %1799 = vrcp.f32 %v1257_v38 }
 0x587   : > { %v1800_v39 = vpop.eup %1799 }
 0x588   : > { %1261 = vst.msk [vmem:[%s525_s25] sm:$0x1] %vm1260_vm2, %v1800_v39 }
 0x589   : > { %2026 = shalt.err (!%p2023_p7)
}
 0x58a   : > { %s2027_s16 = scalar_lea.hbm %s2497_s4, 16  ;;  %s2031_s26 = scalar_lea.hbm %s2545_s11, 32 }
 0x58b   : > { %p2028_p12 = scmp.ne.s32.totalorder %s2497_s4, %s2027_s16  ;;  %p2032_p10 = scmp.lt.s32.totalorder %s2497_s4, %s2545_s11 }
 0x58c   : > { %p2033_p11 = scmp.lt.s32.totalorder %s2031_s26, %s2027_s16 }
 0x58d   : > { %p2029_p0 = pnand %p2028_p12, %p2581_p9 }
 0x58e   : > { %p2034_p13 = por %p2033_p11, %p2032_p10 }
 0x58f   : > { %p2030_p8 = pneg %p2029_p0 }
 0x591   : > { %p2035_p5 = pnand %p2034_p13, %p2030_p8 }
 0x593   : > { %2038 = shalt.err (!%p2035_p5)
}
 0x594   : > { %1665 = dma.vmem_to_hbm [thread:$0]  (%p2581_p9), %s1276_s14, 16, %s2497_s4, %s1263_s15  }
 0x595 PF: > { %s1287_s3 = sand.u32 1, %s2085_s19   ;;  %p2582_p1 = scmp.ne.s32.totalorder %s2569_s27, 0 }
 0x596   : > { %p2583_p4 = scmp.ge.s32.totalorder %s2097_s22, 2  ;;  %s1288_s2 = scalar_lea.sflag [#allocation5], %s1287_s3 }
 0x598   : > { %p1694_p6 = pnand %p2583_p4, %p2582_p1 }
 0x59a   : > { %p1695_p2 = pneg %p1694_p6 }
 0x59c   : > { %2080 = dma.done.wait (%p1695_p2), %s1288_s2, 16  }
 0x59d   : > { %2082 = vsyncadd (%p1695_p2), %s1288_s2, 4294967280  ;;  %s2584_s10 = sld [smem:[#allocation25_spill]]  ;;  %p31_p3 = scmp.ge.s32.totalorder %s2296_s12, 4  }
 0x59e   : > { %s2585_s19 = smov %s2089_s20  ;;  %s2586_s20 = smov %s2093_s21 }
 0x59f   : > { %s2588_s22 = smov %s2296_s12  ;;  %33 = sbr.rel (!%p31_p3) target bundleno = 18 (0x12), region = 146 }
 0x5a3   : > { %s2587_s21 = smov %s2584_s10 }
 0x5a4   :  { %1292 = vsyncpa [#allocation4], 1 }
 0x5a5   :  { %1294 = vsyncpa [#allocation4 + $0x1], 1 }
 0x5a6   :  { %1295 = vsyncpa [#allocation7], 1 }
 0x5a7   :  { %1297 = vsyncpa [#allocation7 + $0x1], 1 }
 0x5a8   :  { %1298 = vsyncpa [#allocation10], 1 }
 0x5a9   :  { %1299 = vsyncpa [#allocation13], 1 }
 0x5aa   :  { %1300 = vsyncpa [#allocation16], 1 }
 0x5ab   :  { %1301 = vsyncpa [#allocation5], 1 }
 0x5ac   :  { %1303 = vsyncpa [#allocation5 + $0x1], 1 }

</bundles_post_ra>
